<compile_context>
chip_gen: v7x
topology: tpu7x:2x2x1
jax: 0.10.0
libtpu: 0.0.40
codegen_flags: <defaults>
</compile_context>

<pallas_src>
import jax
import jax.numpy as jnp
from jax.experimental import pallas as pl
from jax.experimental.pallas import tpu as pltpu


_IN, _H1, _H2, _OUT = 784, 200, 100, 10
_H1P, _H2P, _OUTP = 256, 128, 128      # lane-padded (multiples of 128)
_TB_MAX = 1024                         # batch rows per grid step
_TB_MIN = 16                           # bf16 sublane tile is (16, 128)


def _round_up(v, m):
    return ((v + m - 1) // m) * m


# ------------------------------ Pallas kernel ------------------------------ #

def mlp_kernel(x_ref, w1_ref, b1_ref, w2_ref, b2_ref, w3_ref, b3_ref, o_ref):
    """x_ref: (TB, 784) bf16; w1: (784, 256) bf16; w2: (256, 128) bf16;
    w3: (128, 128) bf16; biases: (1, K) f32; o_ref: (TB, 128) f32.

    Fused fc1+ReLU+fc2+ReLU+fc3+ReLU. bf16 MXU operands, f32 accumulation;
    bias add + ReLU in f32. Intermediates never leave VMEM."""
    h = jnp.dot(x_ref[...], w1_ref[...], preferred_element_type=jnp.float32)
    h = jnp.maximum(h + b1_ref[...], 0.0)
    h = jnp.dot(h.astype(jnp.bfloat16), w2_ref[...], preferred_element_type=jnp.float32)
    h = jnp.maximum(h + b2_ref[...], 0.0)
    h = jnp.dot(h.astype(jnp.bfloat16), w3_ref[...], preferred_element_type=jnp.float32)
    o_ref[...] = jnp.maximum(h + b3_ref[...], 0.0)


# --------------------------------- wrapper --------------------------------- #

def prepare_params(params):
    """One-time layout prep, OUTSIDE the per-call jitted forward:
      * transpose PyTorch (out,in) weights to (in,out),
      * zero-pad widths to multiples of 128 (removes masked lanes / vst.msk),
      * cast weights to bf16 (MXU-native on v5e/v6e/v7x); biases stay f32."""
    w1, b1, w2, b2, w3, b3 = params

    def padw(wt, rows, cols):
        buf = jnp.zeros((rows, cols), jnp.float32)
        return buf.at[: wt.shape[0], : wt.shape[1]].set(wt).astype(jnp.bfloat16)

    def padb(b, cols):
        buf = jnp.zeros((1, cols), jnp.float32)
        return buf.at[0, : b.shape[0]].set(b)

    return (padw(w1.T, _IN, _H1P), padb(b1, _H1P),
            padw(w2.T, _H1P, _H2P), padb(b2, _H2P),
            padw(w3.T, _H2P, _OUTP), padb(b3, _OUTP))


def network2_forward(x, prepared):
    """x: (N, ...) with prod(...) == 784 (e.g. (N, 1, 28, 28)).  Returns (N, 10) f32."""
    w1t, b1r, w2t, b2r, w3t, b3r = prepared
    n = x.shape[0]
    xf = x.reshape(n, -1).astype(jnp.bfloat16)      # flatten + bf16 streaming (half the DMA bytes)
    assert xf.shape[1] == _IN

    # Tile selection: large tiles to amortize per-step overhead, but split the
    # batch into >=2 grid steps whenever possible so both v7x TCs get work.
    tb = min(_TB_MAX, max(_TB_MIN, _round_up((n + 1) // 2, _TB_MIN)))
    grid = (pl.cdiv(n, tb),)                        # ragged tail: Pallas clamps the partial
                                                    # final block (OOB reads unused, OOB writes dropped)
    const = lambda i: (0, 0)                        # weights/biases VMEM-resident across steps

    out = pl.pallas_call(
        mlp_kernel,
        out_shape=jax.ShapeDtypeStruct((n, _OUTP), jnp.float32),
        grid=grid,
        in_specs=[
            pl.BlockSpec((tb, _IN), lambda i: (i, 0)),   # streamed bf16 input tiles
            pl.BlockSpec((_IN, _H1P), const),
            pl.BlockSpec((1, _H1P), const),
            pl.BlockSpec((_H1P, _H2P), const),
            pl.BlockSpec((1, _H2P), const),
            pl.BlockSpec((_H2P, _OUTP), const),
            pl.BlockSpec((1, _OUTP), const),
        ],
        out_specs=pl.BlockSpec((tb, _OUTP), lambda i: (i, 0)),
        compiler_params=pltpu.CompilerParams(
            dimension_semantics=("parallel",),           # megacore sharding on v7x
            vmem_limit_bytes=32 * 1024 * 1024,
        ),
    )(xf, w1t, b1r, w2t, b2r, w3t, b3r)

    return out[:, :_OUT]                                 # drop fc3 lane padding


# -------------------------- params / reference ----------------------------- #

def init_params(key):
    ks = jax.random.split(key, 6)

    def u(k, shape, fan_in):
        bound = 1.0 / jnp.sqrt(jnp.float32(fan_in))
        return jax.random.uniform(k, shape, jnp.float32, -bound, bound)

    w1 = u(ks[0], (_H1, _IN), _IN)    # PyTorch (out, in)
    b1 = u(ks[1], (_H1,), _IN)
    w2 = u(ks[2], (_H2, _H1), _H1)
    b2 = u(ks[3], (_H2,), _H1)
    w3 = u(ks[4], (_OUT, _H2), _H2)
    b3 = u(ks[5], (_OUT,), _H2)
    return w1, b1, w2, b2, w3, b3


def reference_forward(x, params):
    """Pure-JAX (f32) replica of the PyTorch Network2.forward."""
    w1, b1, w2, b2, w3, b3 = params
    h = x.reshape(x.shape[0], -1)
    h = jnp.maximum(h @ w1.T + b1, 0.0)
    h = jnp.maximum(h @ w2.T + b2, 0.0)
    h = jnp.maximum(h @ w3.T + b3, 0.0)
    return h


# --------------------------------- main ------------------------------------ #

if __name__ == "__main__":
    key = jax.random.PRNGKey(0)
    kx, kp = jax.random.split(key)

    # torch.flatten(x, 1) must produce 784 features -> (N, 1, 28, 28).
    x = jax.random.normal(kx, (2, 1, 28, 28), jnp.float32)
    params = init_params(kp)
    prepared = prepare_params(params)          # one-time transpose/pad/bf16 cast, outside jit

    fwd = jax.jit(network2_forward)
    out = jax.block_until_ready(fwd(x, prepared))

    ref = reference_forward(x, params)
    assert out.shape == (2, _OUT) and out.dtype == jnp.float32
    # bf16 MXU operands vs f32 reference -> loose tolerance.
    assert jnp.allclose(out, ref, atol=2e-2, rtol=2e-2), "mismatch vs pure-JAX reference"

    # Exercise the multi-step gridded path (grid > 1, ragged final block, no jnp.pad).
    xb = jax.random.normal(kx, (300, 1, 28, 28), jnp.float32)
    outb = jax.block_until_ready(fwd(xb, prepared))
    refb = reference_forward(xb, params)
    assert outb.shape == (300, _OUT)
    assert jnp.allclose(outb, refb, atol=2e-2, rtol=2e-2), "mismatch on tiled batch path"

    print("KERNEL_OK")
</pallas_src>

<mosaic_0001>
module attributes {stable_mosaic.version = 11 : i64} {
  func.func @mlp_kernel(%arg0: i32, %arg1: memref<16x784xbf16, #tpu.memory_space<vmem>>, %arg2: memref<784x256xbf16, #tpu.memory_space<vmem>>, %arg3: memref<1x256xf32, #tpu.memory_space<vmem>>, %arg4: memref<256x128xbf16, #tpu.memory_space<vmem>>, %arg5: memref<1x128xf32, #tpu.memory_space<vmem>>, %arg6: memref<128x128xbf16, #tpu.memory_space<vmem>>, %arg7: memref<1x128xf32, #tpu.memory_space<vmem>>, %arg8: memref<16x128xf32, #tpu.memory_space<vmem>>) attributes {dimension_semantics = [#tpu.dimension_semantics<parallel>], iteration_bounds = array<i64: 1>, scalar_prefetch = 0 : i64, scratch_operands = 0 : i64, tpu.core_type = #tpu.core_type<tc>, window_params = [{transform_indices = @transform_0, window_bounds = array<i64: 16, 784>}, {pipeline_mode = #tpu.pipeline_mode<synchronous>, transform_indices = @transform_1, window_bounds = array<i64: 784, 256>}, {pipeline_mode = #tpu.pipeline_mode<synchronous>, transform_indices = @transform_2, window_bounds = array<i64: 1, 256>}, {pipeline_mode = #tpu.pipeline_mode<synchronous>, transform_indices = @transform_3, window_bounds = array<i64: 256, 128>}, {pipeline_mode = #tpu.pipeline_mode<synchronous>, transform_indices = @transform_4, window_bounds = array<i64: 1, 128>}, {pipeline_mode = #tpu.pipeline_mode<synchronous>, transform_indices = @transform_5, window_bounds = array<i64: 128, 128>}, {pipeline_mode = #tpu.pipeline_mode<synchronous>, transform_indices = @transform_6, window_bounds = array<i64: 1, 128>}, {transform_indices = @transform_7, window_bounds = array<i64: 16, 128>}]} {
    %c0 = arith.constant 0 : index
    %c0_0 = arith.constant 0 : index
    %0 = vector.load %arg1[%c0, %c0_0] : memref<16x784xbf16, #tpu.memory_space<vmem>>, vector<16x784xbf16>
    %c0_1 = arith.constant 0 : index
    %c0_2 = arith.constant 0 : index
    %1 = vector.load %arg2[%c0_1, %c0_2] : memref<784x256xbf16, #tpu.memory_space<vmem>>, vector<784x256xbf16>
    %cst = arith.constant dense<0.000000e+00> : vector<16x256xf32>
    %2 = tpu.matmul %0, %1, %cst {dimension_numbers = #tpu.dot_dimension_numbers<[1], [0], [0], [1], [0, 0, 1, 1], [], []>} : vector<16x784xbf16>, vector<784x256xbf16>, vector<16x256xf32> -> vector<16x256xf32>
    %c0_3 = arith.constant 0 : index
    %c0_4 = arith.constant 0 : index
    %3 = vector.load %arg3[%c0_3, %c0_4] : memref<1x256xf32, #tpu.memory_space<vmem>>, vector<1x256xf32>
    %4 = vector.broadcast %3 : vector<1x256xf32> to vector<16x256xf32>
    %5 = arith.addf %2, %4 : vector<16x256xf32>
    %cst_5 = arith.constant 0.000000e+00 : f32
    %6 = vector.broadcast %cst_5 : f32 to vector<16x256xf32>
    %7 = arith.maximumf %5, %6 : vector<16x256xf32>
    %8 = arith.truncf %7 : vector<16x256xf32> to vector<16x256xbf16>
    %c0_6 = arith.constant 0 : index
    %c0_7 = arith.constant 0 : index
    %9 = vector.load %arg4[%c0_6, %c0_7] : memref<256x128xbf16, #tpu.memory_space<vmem>>, vector<256x128xbf16>
    %cst_8 = arith.constant dense<0.000000e+00> : vector<16x128xf32>
    %10 = tpu.matmul %8, %9, %cst_8 {dimension_numbers = #tpu.dot_dimension_numbers<[1], [0], [0], [1], [0, 0, 1, 1], [], []>} : vector<16x256xbf16>, vector<256x128xbf16>, vector<16x128xf32> -> vector<16x128xf32>
    %c0_9 = arith.constant 0 : index
    %c0_10 = arith.constant 0 : index
    %11 = vector.load %arg5[%c0_9, %c0_10] : memref<1x128xf32, #tpu.memory_space<vmem>>, vector<1x128xf32>
    %12 = vector.broadcast %11 : vector<1x128xf32> to vector<16x128xf32>
    %13 = arith.addf %10, %12 : vector<16x128xf32>
    %cst_11 = arith.constant 0.000000e+00 : f32
    %14 = vector.broadcast %cst_11 : f32 to vector<16x128xf32>
    %15 = arith.maximumf %13, %14 : vector<16x128xf32>
    %16 = arith.truncf %15 : vector<16x128xf32> to vector<16x128xbf16>
    %c0_12 = arith.constant 0 : index
    %c0_13 = arith.constant 0 : index
    %17 = vector.load %arg6[%c0_12, %c0_13] : memref<128x128xbf16, #tpu.memory_space<vmem>>, vector<128x128xbf16>
    %cst_14 = arith.constant dense<0.000000e+00> : vector<16x128xf32>
    %18 = tpu.matmul %16, %17, %cst_14 {dimension_numbers = #tpu.dot_dimension_numbers<[1], [0], [0], [1], [0, 0, 1, 1], [], []>} : vector<16x128xbf16>, vector<128x128xbf16>, vector<16x128xf32> -> vector<16x128xf32>
    %c0_15 = arith.constant 0 : index
    %c0_16 = arith.constant 0 : index
    %19 = vector.load %arg7[%c0_15, %c0_16] : memref<1x128xf32, #tpu.memory_space<vmem>>, vector<1x128xf32>
    %20 = vector.broadcast %19 : vector<1x128xf32> to vector<16x128xf32>
    %21 = arith.addf %18, %20 : vector<16x128xf32>
    %cst_17 = arith.constant 0.000000e+00 : f32
    %22 = vector.broadcast %cst_17 : f32 to vector<16x128xf32>
    %23 = arith.maximumf %21, %22 : vector<16x128xf32>
    %c0_18 = arith.constant 0 : index
    %c0_19 = arith.constant 0 : index
    %24 = vector.load %arg8[%c0_18, %c0_19] : memref<16x128xf32, #tpu.memory_space<vmem>>, vector<16x128xf32>
    tpu.vector_store %arg8[%c0_18, %c0_19], %23 {strides = array<i32>} : memref<16x128xf32, #tpu.memory_space<vmem>>, vector<16x128xf32>,
    return
  }
  func.func @transform_0(%arg0: i32) -> (i32, i32) {
    %c0_i32 = arith.constant 0 : i32
    %c0_i32_0 = arith.constant 0 : i32
    return %arg0, %c0_i32 : i32, i32
  }
  func.func @transform_1(%arg0: i32) -> (i32, i32) {
    %c0_i32 = arith.constant 0 : i32
    %c0_i32_0 = arith.constant 0 : i32
    %c0_i32_1 = arith.constant 0 : i32
    return %c0_i32, %c0_i32_0 : i32, i32
  }
  func.func @transform_2(%arg0: i32) -> (i32, i32) {
    %c0_i32 = arith.constant 0 : i32
    %c0_i32_0 = arith.constant 0 : i32
    %c0_i32_1 = arith.constant 0 : i32
    return %c0_i32, %c0_i32_0 : i32, i32
  }
  func.func @transform_3(%arg0: i32) -> (i32, i32) {
    %c0_i32 = arith.constant 0 : i32
    %c0_i32_0 = arith.constant 0 : i32
    %c0_i32_1 = arith.constant 0 : i32
    return %c0_i32, %c0_i32_0 : i32, i32
  }
  func.func @transform_4(%arg0: i32) -> (i32, i32) {
    %c0_i32 = arith.constant 0 : i32
    %c0_i32_0 = arith.constant 0 : i32
    %c0_i32_1 = arith.constant 0 : i32
    return %c0_i32, %c0_i32_0 : i32, i32
  }
  func.func @transform_5(%arg0: i32) -> (i32, i32) {
    %c0_i32 = arith.constant 0 : i32
    %c0_i32_0 = arith.constant 0 : i32
    %c0_i32_1 = arith.constant 0 : i32
    return %c0_i32, %c0_i32_0 : i32, i32
  }
  func.func @transform_6(%arg0: i32) -> (i32, i32) {
    %c0_i32 = arith.constant 0 : i32
    %c0_i32_0 = arith.constant 0 : i32
    %c0_i32_1 = arith.constant 0 : i32
    return %c0_i32, %c0_i32_0 : i32, i32
  }
  func.func @transform_7(%arg0: i32) -> (i32, i32) {
    %c0_i32 = arith.constant 0 : i32
    %c0_i32_0 = arith.constant 0 : i32
    return %arg0, %c0_i32 : i32, i32
  }
}

</mosaic_0001>

<bundles_post_ra>
// kernel: network2_forward.1
= control target key start
LH: loop header
LB: loop body
LE: loop exit
PB: predicated region body
PF: predicated region fallthrough
CT: control target
= control target key end

     0   :  { %12 = vsyncpa [#allocation3], 0  ;;  %s2015_s0 = inlined_call_operand.vmem [shape: bf16[2,784], index: 0, kind: input, shape index: {}]   ;;  %s2016_s1 = inlined_call_operand.hbm [shape: bf16[784,256], index: 1, kind: input, shape index: {}]   ;;  %s2017_s2 = inlined_call_operand.vmem [shape: f32[1,256], index: 2, kind: input, shape index: {}]   ;;  %s2018_s3 = inlined_call_operand.vmem [shape: bf16[256,128], index: 3, kind: input, shape index: {}]   ;;  %s2019_s4 = inlined_call_operand.vmem [shape: f32[1,128], index: 4, kind: input, shape index: {}]   ;;  %s2020_s5 = inlined_call_operand.hbm [shape: bf16[128,128], index: 5, kind: input, shape index: {}]   ;;  %s2021_s6 = inlined_call_operand.vmem [shape: f32[1,128], index: 6, kind: input, shape index: {}]   ;;  %s2022_s7 = inlined_call_operand.hbm [shape: f32[2,128], index: 7, kind: output, shape index: {}]  }
   0x1   :  { %13 = vsyncpa [#allocation6], 0 }
   0x2   :  { %14 = vsyncpa [#allocation4], 0  ;;  %s1768_s24 = smov [#allocation2]   ;;  %s1696_s28 = scalar_lea.hbm %s2016_s1, 12544 }
   0x3   :  { %s22_s25 = sshll.u32 %s1768_s24, 4  ;;  %p1697_p0 = scmp.ne.s32.totalorder %s2016_s1, %s1696_s28  ;;  %s23_s25 = int_to_ptr.vmem [resolvable:$true] %s22_s25 }
   0x4   :  { %p1700_p1 = scmp.lt.u32.totalorder %s1696_s28, %s2016_s1 }
   0x6   :  { %p1702_p2 = pnand %p1700_p1, %p1697_p0 }
   0x8   :  { %1705 = shalt.err (!%p1702_p2)
}
   0x9   :  { %s1706_s10 = scalar_lea.vmem %s23_s25, 12544  ;;  %p1711_p4 = scmp.lt.s32.totalorder %s23_s25, %s23_s25 }
   0xa   :  { %p1707_p3 = scmp.ne.s32.totalorder %s23_s25, %s1706_s10  ;;  %p1712_p5 = scmp.lt.s32.totalorder %s1706_s10, %s1706_s10 }
   0xc   :  { %p1713_p6 = por %p1712_p5, %p1711_p4 }
   0xe   :  { %p1714_p7 = pnand %p1713_p6, %p1707_p3 }
  0x10   :  { %1717 = shalt.err (!%p1714_p7)
}
  0x11   :  { %s1769_s11 = smov 128   ;;  %s1770_s12 = smov 8  }
  0x12   :  { %28 = dma.hbm_to_vmem [thread:$0]  %s2016_s1, 12544, %s23_s25, [#allocation3], %s1769_s11, %s1769_s11, %s1770_s12  }
  0x13   :  { %s1771_s15 = smov [#allocation5]   ;;  %s1718_s19 = scalar_lea.hbm %s2020_s5, 1024 }
  0x14   :  { %s40_s16 = sshll.u32 %s1771_s15, 4  ;;  %p1719_p8 = scmp.ne.s32.totalorder %s2020_s5, %s1718_s19  ;;  %s41_s16 = int_to_ptr.vmem [resolvable:$true] %s40_s16 }
  0x15   :  { %p1722_p9 = scmp.lt.u32.totalorder %s1718_s19, %s2020_s5 }
  0x17   :  { %p1724_p10 = pnand %p1722_p9, %p1719_p8 }
  0x19   :  { %1727 = shalt.err (!%p1724_p10)
}
  0x1a   :  { %s1728_s24 = scalar_lea.vmem %s41_s16, 1024  ;;  %p1733_p12 = scmp.lt.s32.totalorder %s41_s16, %s41_s16 }
  0x1b   :  { %p1729_p11 = scmp.ne.s32.totalorder %s41_s16, %s1728_s24  ;;  %p1734_p13 = scmp.lt.s32.totalorder %s1728_s24, %s1728_s24 }
  0x1d   :  { %p1735_p0 = por %p1734_p13, %p1733_p12 }
  0x1f   :  { %p1736_p1 = pnand %p1735_p0, %p1729_p11 }
  0x21   :  { %1739 = shalt.err (!%p1736_p1)
}
  0x22   :  { %s1772_s1 = smov 64   ;;  %s1773_s25 = smov 4  }
  0x23   :  { %46 = dma.hbm_to_vmem [thread:$0]  %s2020_s5, 1024, %s41_s16, [#allocation6], %s1772_s1, %s1772_s1, %s1773_s25  }
  0x24   :  { %1762 = dma.done.wait [#allocation3], 12544  }
  0x25   :  { %1763 = vsyncadd [#allocation3], 4294954752 }
  0x26   :  { %1764 = dma.done.wait [#allocation6], 1024  }
  0x27   :  { %1765 = vsyncadd [#allocation6], 4294966272  ;;  %v1513_v0 = vld [vmem:[#allocation2 + $0x104] ss:$8 sps:$4 sm:$0xff]   ;;  %v1515_v1 = vld [vmem:[#allocation2 + $0x100] ss:$8 sps:$4 sm:$0xff]   ;;  %v164_v9 = vlaneseq }
  0x28   :  { %860 = vmatprep.subr.bf16.mxu0 %v1513_v0  ;;  %v1516_v2 = vld [vmem:[#allocation2 + $0x114] ss:$8 sps:$4 sm:$0xff]   ;;  %v1518_v3 = vld [vmem:[#allocation2 + $0x110] ss:$8 sps:$4 sm:$0xff]   ;;  %v1519_v4 = vld [vmem:[#allocation2 + $0x124] ss:$8 sps:$4 sm:$0xff]  }
  0x29   :  { %861 = vmatpush1.bf16.msra.mxu0 %v1515_v1  ;;  %v1521_v5 = vld [vmem:[#allocation2 + $0x120] ss:$8 sps:$4 sm:$0xff]   ;;  %v1522_v6 = vld [vmem:[#allocation2 + $0x134] ss:$8 sps:$4 sm:$0xff]   ;;  %v1524_v7 = vld [vmem:[#allocation2 + $0x130] ss:$8 sps:$4 sm:$0xff]  }
  0x2a   :  { %862 = vmatprep.subr.bf16.mxu0 %v1516_v2  ;;  %v1525_v8 = vld [vmem:[#allocation2 + $0x144] ss:$8 sps:$4 sm:$0xff]   ;;  %v1774_v10 = vmov 1966171168   ;;  %v1527_v12 = vld [vmem:[#allocation2 + $0x140] ss:$8 sps:$4 sm:$0xff]  }
  0x2b   :  { %v191_v11 = vunpack.c.l.s4 %v1774_v10  ;;  %v1528_v13 = vld [vmem:[#allocation2 + $0x154] ss:$8 sps:$4 sm:$0xff]   ;;  %v1845_v14 = vshrl.u32 %v164_v9, 7  ;;  %v1530_v16 = vld [vmem:[#allocation2 + $0x150] ss:$8 sps:$4 sm:$0xff]   ;;  %vm813_vm0 = vcmask 130048  }
  0x2c   :  { %v1531_v17 = vld [vmem:[#allocation2 + $0x164] ss:$8 sps:$4 sm:$0xff]   ;;  %v1533_v18 = vld [vmem:[#allocation2 + $0x160] ss:$8 sps:$4 sm:$0xff]   ;;  %v1534_v19 = vld [vmem:[#allocation2 + $0x174] ss:$8 sps:$4 sm:$0xff]  }
  0x2d   :  { %863 = vmatpush1.bf16.msra.mxu0 %v1518_v3  ;;  %v192_v15 = vunpack.c.0.s8 %v191_v11  ;;  %v1561_v21 = vld [vmem:[%s2015_s0] ss:$7 sps:$4 sm:$0xff]   ;;  %v1563_v22 = vld [vmem:[%s2015_s0 + $0x4] ss:$7 sps:$4 sm:$0x77]   ;;  %vm1777_vm1 = vmmov 0  }
  0x2e   :  { %864 = vmatprep.subr.bf16.mxu0 %v1519_v4  ;;  %v1536_v23 = vld [vmem:[#allocation2 + $0x170] ss:$8 sps:$4 sm:$0xff]   ;;  %v1567_v26 = vld [vmem:[%s2015_s0 + $0x1c] ss:$7 sps:$4 sm:$0xff]  }
  0x2f   :  { %v1848_v20 = vsub.s32 %v192_v15, %v1845_v14  ;;  %v1564_v24 = vld [vmem:[%s2015_s0 + $0xe] ss:$7 sps:$4 sm:$0xff]   ;;  %v1566_v25 = vld [vmem:[%s2015_s0 + $0x12] ss:$7 sps:$4 sm:$0x77]  }
  0x30   :  { %v1569_v27 = vld [vmem:[%s2015_s0 + $0x20] ss:$7 sps:$4 sm:$0x77]   ;;  %v1570_v30 = vld [vmem:[%s2015_s0 + $0x2a] ss:$7 sps:$4 sm:$0xff]  }
  0x31   :  { %865 = vmatpush1.bf16.msra.mxu0 %v1521_v5  ;;  %v1869_v28 = vrot.slane %v1561_v21, %v1848_v20  ;;  %v1872_v29 = vrot.slane %v1563_v22, %v1848_v20  ;;  %v1572_v31 = vld [vmem:[%s2015_s0 + $0x2e] ss:$7 sps:$4 sm:$0x77]   ;;  %v1881_v32 = vrot.slane %v1564_v24, %v1848_v20  ;;  %v1884_v33 = vrot.slane %v1566_v25, %v1848_v20  ;;  %v1539_v42 = vld [vmem:[#allocation2 + $0x180] ss:$8 sps:$4 sm:$0xff]  }
  0x32   :  { %866 = vmatprep.subr.bf16.mxu0 %v1522_v6  ;;  %v1537_v34 = vld [vmem:[#allocation2 + $0x184] ss:$8 sps:$4 sm:$0xff]   ;;  %v1887_v35 = vrot.slane %v1567_v26, %v1848_v20  ;;  %v1890_v36 = vrot.slane %v1569_v27, %v1848_v20  ;;  %v1893_v37 = vrot.slane %v1570_v30, %v1848_v20  ;;  %v1898_v39 = vrot.slane %v1572_v31, %v1848_v20  ;;  %v1540_v43 = vld [vmem:[#allocation2 + $0x194] ss:$8 sps:$4 sm:$0xff]   ;;  %v1584_v46 = vld [vmem:[#allocation2] ss:$8 sps:$4 sm:$0xff]  }
  0x33   :  { %v247_v38 = vcombine.high %v1869_v28, %v1881_v32  ;;  %v1579_v40 = vld [vmem:[#allocation2 + $0x4] ss:$8 sps:$4 sm:$0xff]   ;;  %v248_v41 = vcombine.low %v1872_v29, %v1884_v33  ;;  %v1585_v47 = vld [vmem:[#allocation2 + $0x14] ss:$8 sps:$4 sm:$0xff]   ;;  %v1542_v51 = vld [vmem:[#allocation2 + $0x190] ss:$8 sps:$4 sm:$0xff]  }
  0x34   :  { %v251_v44 = vcombine.high %v1887_v35, %v1893_v37  ;;  %817 = vmatprep.subr.bf16.mxu1 %v1579_v40  ;;  %v252_v48 = vcombine.low %v1890_v36, %v1898_v39  ;;  %v1590_v52 = vld [vmem:[#allocation2 + $0x10] ss:$8 sps:$4 sm:$0xff]   ;;  %v1591_v55 = vld [vmem:[#allocation2 + $0x24] ss:$8 sps:$4 sm:$0xff]   ;;  %v1596_v60 = vld [vmem:[#allocation2 + $0x20] ss:$8 sps:$4 sm:$0xff]   ;;  %v250_v15 = vcombine.low %v1887_v35, %v1893_v37 }
  0x35   :  { %867 = vmatpush1.bf16.msra.mxu0 %v1524_v7  ;;  %v274_v45 = vrot.slane %v247_v38, %v1848_v20  ;;  %818 = vmatpush1.bf16.msra.mxu1 %v1584_v46  ;;  %v1909_v50 = vrot.slane %v248_v41, %v1848_v20  ;;  %v1543_v57 = vld [vmem:[#allocation2 + $0x1a4] ss:$8 sps:$4 sm:$0xff]   ;;  %v1597_v61 = vld [vmem:[#allocation2 + $0x34] ss:$8 sps:$4 sm:$0xff]   ;;  %v1545_v62 = vld [vmem:[#allocation2 + $0x1a0] ss:$8 sps:$4 sm:$0xff]  }
  0x36   :  { %868 = vmatprep.subr.bf16.mxu0 %v1525_v8  ;;  %v302_v49 = vrot.slane %v251_v44, %v1848_v20  ;;  %819 = vmatprep.subr.bf16.mxu1 %v1585_v47  ;;  %v1912_v53 = vrot.slane %v252_v48, %v1848_v20  ;;  %v1546_v63 = vld [vmem:[#allocation2 + $0x1b4] ss:$8 sps:$4 sm:$0xff]   ;;  %v1602_v0 = vld [vmem:[#allocation2 + $0x30] ss:$8 sps:$4 sm:$0xff]   ;;  %v1603_v1 = vld [vmem:[#allocation2 + $0x44] ss:$8 sps:$4 sm:$0xff]   ;;  %v1930_v24 = vrot.slane %v250_v15, %v1848_v20 }
  0x37   :  { %v1548_v2 = vld [vmem:[#allocation2 + $0x1b0] ss:$8 sps:$4 sm:$0xff]   ;;  %v1549_v3 = vld [vmem:[#allocation2 + $0x1c4] ss:$8 sps:$4 sm:$0xff]   ;;  %v1608_v4 = vld [vmem:[#allocation2 + $0x40] ss:$8 sps:$4 sm:$0xff]  }
  0x38   :  { %v315_v54 = vcombine.high %v274_v45, %v302_v49  ;;  %v314_v56 = vcombine.low %v274_v45, %v302_v49  ;;  %v312_v58 = vcombine.low %v1909_v50, %v1912_v53  ;;  %v313_v59 = vcombine.high %v1909_v50, %v1912_v53  ;;  %v1609_v5 = vld [vmem:[#allocation2 + $0x54] ss:$8 sps:$4 sm:$0xff]   ;;  %v1551_v6 = vld [vmem:[#allocation2 + $0x1c0] ss:$8 sps:$4 sm:$0xff]   ;;  %v1614_v8 = vld [vmem:[#allocation2 + $0x50] ss:$8 sps:$4 sm:$0xff]  }
  0x39   :  { %869 = vmatpush1.bf16.msra.mxu0 %v1527_v12  ;;  %820 = vmatpush1.bf16.msra.mxu1 %v1590_v52  ;;  %v1552_v7 = vld [vmem:[#allocation2 + $0x1d4] ss:$8 sps:$4 sm:$0xff]   ;;  %v1615_v9 = vld [vmem:[#allocation2 + $0x64] ss:$8 sps:$4 sm:$0xff]   ;;  %v1554_v10 = vld [vmem:[#allocation2 + $0x1d0] ss:$8 sps:$4 sm:$0xff]  }
  0x3a   :  { %870 = vmatprep.subr.bf16.mxu0 %v1528_v13  ;;  %892 = vmatprep.mubr.bf16.mxu0 %v315_v54  ;;  %v1555_v11 = vld [vmem:[#allocation2 + $0x1e4] ss:$8 sps:$4 sm:$0xff]   ;;  %v1620_v12 = vld [vmem:[#allocation2 + $0x60] ss:$8 sps:$4 sm:$0xff]   ;;  %v246_v13 = vcombine.low %v1869_v28, %v1881_v32  ;;  %v1558_v21 = vld [vmem:[#allocation2 + $0x1f4] ss:$8 sps:$4 sm:$0xff]  }
  0x3b   :  { %821 = vmatprep.subr.bf16.mxu1 %v1591_v55  ;;  %849 = vmatprep.mubr.bf16.mxu1 %v314_v56  ;;  %v1626_v22 = vld [vmem:[#allocation2 + $0x70] ss:$8 sps:$4 sm:$0xff]   ;;  %v1627_v25 = vld [vmem:[#allocation2 + $0x84] ss:$8 sps:$4 sm:$0xff]   ;;  %v1632_v30 = vld [vmem:[#allocation2 + $0x80] ss:$8 sps:$4 sm:$0xff]  }
  0x3c   :  { %v1560_v26 = vld [vmem:[#allocation2 + $0x1f0] ss:$8 sps:$4 sm:$0xff]   ;;  %v1633_v32 = vld [vmem:[#allocation2 + $0x94] ss:$8 sps:$4 sm:$0xff]   ;;  %v1639_v37 = vld [vmem:[#allocation2 + $0xa4] ss:$8 sps:$4 sm:$0xff]  }
  0x3d   :  { %871 = vmatpush1.bf16.msra.mxu0 %v1530_v16  ;;  %822 = vmatpush1.bf16.msra.mxu1 %v1596_v60  ;;  %v1621_v16 = vld [vmem:[#allocation2 + $0x74] ss:$8 sps:$4 sm:$0xff]   ;;  %v1583_v38 = vld [vmem:[#allocation2 + $0x224] ss:$8 sps:$4 sm:$0xff]   ;;  %v1581_v41 = vld [vmem:[#allocation2 + $0x220] ss:$8 sps:$4 sm:$0xff]  }
  0x3e   :  { %872 = vmatprep.subr.bf16.mxu0 %v1531_v17  ;;  %823 = vmatprep.subr.bf16.mxu1 %v1597_v61  ;;  %v1557_v17 = vld [vmem:[#allocation2 + $0x1e0] ss:$8 sps:$4 sm:$0xff]   ;;  %v1578_v35 = vld [vmem:[#allocation2 + $0x214] ss:$8 sps:$4 sm:$0xff]   ;;  %v1651_v44 = vld [vmem:[#allocation2 + $0xc4] ss:$8 sps:$4 sm:$0xff]  }
  0x3f   :  { %v1645_v40 = vld [vmem:[#allocation2 + $0xb4] ss:$8 sps:$4 sm:$0xff]   ;;  %v1587_v45 = vld [vmem:[#allocation2 + $0x230] ss:$8 sps:$4 sm:$0xff]   ;;  %v1595_v46 = vld [vmem:[#allocation2 + $0x244] ss:$8 sps:$4 sm:$0xff]  }
  0x40   :  { %v1593_v47 = vld [vmem:[#allocation2 + $0x240] ss:$8 sps:$4 sm:$0xff]   ;;  %v1657_v49 = vld [vmem:[#allocation2 + $0xd4] ss:$8 sps:$4 sm:$0xff]   ;;  %v1662_v52 = vld [vmem:[#allocation2 + $0xd0] ss:$8 sps:$4 sm:$0xff]  }
  0x41   :  { %873 = vmatpush1.bf16.msra.mxu0 %v1533_v18  ;;  %824 = vmatpush1.bf16.msra.mxu1 %v1602_v0  ;;  %v249_v18 = vcombine.high %v1872_v29, %v1884_v33  ;;  %v1575_v29 = vld [vmem:[#allocation2 + $0x204] ss:$8 sps:$4 sm:$0xff]   ;;  %v1573_v33 = vld [vmem:[#allocation2 + $0x200] ss:$8 sps:$4 sm:$0xff]   ;;  %v1599_v55 = vld [vmem:[#allocation2 + $0x250] ss:$8 sps:$4 sm:$0xff]  }
  0x42   :  { %874 = vmatprep.subr.bf16.mxu0 %v1534_v19  ;;  %825 = vmatprep.subr.bf16.mxu1 %v1603_v1  ;;  %v253_v19 = vcombine.high %v1890_v36, %v1898_v39  ;;  %v1638_v36 = vld [vmem:[#allocation2 + $0x90] ss:$8 sps:$4 sm:$0xff]   ;;  %v1644_v39 = vld [vmem:[#allocation2 + $0xa0] ss:$8 sps:$4 sm:$0xff]   ;;  %v1663_v54 = vld [vmem:[#allocation2 + $0xe4] ss:$8 sps:$4 sm:$0xff]  }
  0x43   :  { %v281_v27 = vrot.slane %v249_v18, %v1848_v20  ;;  %v1656_v48 = vld [vmem:[#allocation2 + $0xc0] ss:$8 sps:$4 sm:$0xff]   ;;  %v1607_v56 = vld [vmem:[#allocation2 + $0x264] ss:$8 sps:$4 sm:$0xff]   ;;  %v1669_v60 = vld [vmem:[#allocation2 + $0xf4] ss:$8 sps:$4 sm:$0xff]  }
  0x44   :  { %v309_v28 = vrot.slane %v253_v19, %v1848_v20  ;;  %v1605_v61 = vld [vmem:[#allocation2 + $0x260] ss:$8 sps:$4 sm:$0xff]   ;;  %v1611_v1 = vld [vmem:[#allocation2 + $0x270] ss:$8 sps:$4 sm:$0xff]  }
  0x45   :  { %875 = vmatpush1.bf16.msra.mxu0 %v1536_v23  ;;  %826 = vmatpush1.bf16.msra.mxu1 %v1608_v4  ;;  %v1927_v23 = vrot.slane %v246_v13, %v1848_v20  ;;  %v1576_v20 = vld [vmem:[#allocation2 + $0x210] ss:$8 sps:$4 sm:$0xff]   ;;  %v1672_v0 = vld [vmem:[%s2018_s3 + $0x40] sm:$0xff]  }
  0x46   :  { %876 = vmatprep.subr.bf16.mxu0 %v1537_v34  ;;  %827 = vmatprep.subr.bf16.mxu1 %v1609_v5  ;;  %v316_v34 = vcombine.low %v281_v27, %v309_v28  ;;  %v1673_v4 = vld [vmem:[%s2018_s3] sm:$0xff]   ;;  %v1674_v5 = vld [vmem:[%s2018_s3 + $0x48] sm:$0xff]   ;;  %v1678_v13 = vld [vmem:[%s2018_s3 + $0x58] sm:$0xff]  }
  0x47   :  { %v311_v31 = vcombine.high %v1927_v23, %v1930_v24  ;;  %v1629_v15 = vld [vmem:[#allocation2 + $0x2a0] ss:$8 sps:$4 sm:$0xff]   ;;  %v1635_v19 = vld [vmem:[#allocation2 + $0x2b0] ss:$8 sps:$4 sm:$0xff]   ;;  %v1661_v27 = vld [vmem:[#allocation2 + $0x2f4] ss:$8 sps:$4 sm:$0xff]  }
  0x48   :  { %v1680_v18 = vld [vmem:[%s2018_s3 + $0x60] sm:$0xff]   ;;  %v1659_v28 = vld [vmem:[#allocation2 + $0x2f0] ss:$8 sps:$4 sm:$0xff]  }
  0x49   :  { %877 = vmatpush1.bf16.msra.mxu0 %v1539_v42  ;;  %828 = vmatpush1.bf16.msra.mxu1 %v1614_v8  ;;  %v1589_v42 = vld [vmem:[#allocation2 + $0x234] ss:$8 sps:$4 sm:$0xff]   ;;  %v1675_v8 = vld [vmem:[%s2018_s3 + $0x8] sm:$0xff]  }
  0x4a   :  { %878 = vmatprep.subr.bf16.mxu0 %v1540_v43  ;;  %829 = vmatprep.subr.bf16.mxu1 %v1615_v9  ;;  %v1650_v43 = vld [vmem:[#allocation2 + $0xb0] ss:$8 sps:$4 sm:$0xff]  }
  0x4b   :  { %v1676_v9 = vld [vmem:[%s2018_s3 + $0x50] sm:$0xff]  }
  0x4c   :  { %v1684_v50 = vld [vmem:[%s2018_s3 + $0x70] sm:$0xff]  }
  0x4d   :  { %879 = vmatpush1.bf16.msra.mxu0 %v1542_v51  ;;  %830 = vmatpush1.bf16.msra.mxu1 %v1620_v12  ;;  %v1601_v51 = vld [vmem:[#allocation2 + $0x254] ss:$8 sps:$4 sm:$0xff]  }
  0x4e   :  { %880 = vmatprep.subr.bf16.mxu0 %v1543_v57  ;;  %831 = vmatprep.subr.bf16.mxu1 %v1621_v16  ;;  %v1668_v57 = vld [vmem:[#allocation2 + $0xe0] ss:$8 sps:$4 sm:$0xff]   ;;  %v1677_v12 = vld [vmem:[%s2018_s3 + $0x10] sm:$0xff]  }
  0x4f   :  { %v1637_v16 = vld [vmem:[#allocation2 + $0x2b4] ss:$8 sps:$4 sm:$0xff]  }
  0x50   :  { %v1685_v53 = vld [vmem:[%s2018_s3 + $0x30] sm:$0xff]  }
  0x51   :  { %881 = vmatpush1.bf16.msra.mxu0 %v1545_v62  ;;  %832 = vmatpush1.bf16.msra.mxu1 %v1626_v22  ;;  %v1613_v62 = vld [vmem:[#allocation2 + $0x274] ss:$8 sps:$4 sm:$0xff]   ;;  %v1641_v22 = vld [vmem:[#allocation2 + $0x2c0] ss:$8 sps:$4 sm:$0xff]  }
  0x52   :  { %882 = vmatprep.subr.bf16.mxu0 %v1546_v63  ;;  %833 = vmatprep.subr.bf16.mxu1 %v1627_v25  ;;  %v1671_v63 = vld [vmem:[#allocation2 + $0xf0] ss:$8 sps:$4 sm:$0xff]   ;;  %v1655_v25 = vld [vmem:[#allocation2 + $0x2e4] ss:$8 sps:$4 sm:$0xff]  }
  0x55   :  { %883 = vmatpush1.bf16.msra.mxu0 %v1548_v2  ;;  %834 = vmatpush1.bf16.msra.mxu1 %v1632_v30  ;;  %v1619_v2 = vld [vmem:[#allocation2 + $0x284] ss:$8 sps:$4 sm:$0xff]   ;;  %v1665_v30 = vld [vmem:[#allocation2 + $0x300] ss:$8 sps:$4 sm:$0xff]  }
  0x56   :  { %884 = vmatprep.subr.bf16.mxu0 %v1549_v3  ;;  %835 = vmatprep.subr.bf16.mxu1 %v1633_v32  ;;  %v310_v3 = vcombine.low %v1927_v23, %v1930_v24  ;;  %v1649_v23 = vld [vmem:[#allocation2 + $0x2d4] ss:$8 sps:$4 sm:$0xff]   ;;  %v1647_v24 = vld [vmem:[#allocation2 + $0x2d0] ss:$8 sps:$4 sm:$0xff]   ;;  %v1681_v32 = vld [vmem:[%s2018_s3 + $0x20] sm:$0xff]  }
  0x59   :  { %885 = vmatpush1.bf16.msra.mxu0 %v1551_v6  ;;  %836 = vmatpush1.bf16.msra.mxu1 %v1638_v36  ;;  %v1617_v6 = vld [vmem:[#allocation2 + $0x280] ss:$8 sps:$4 sm:$0xff]  }
  0x5a   :  { %886 = vmatprep.subr.bf16.mxu0 %v1552_v7  ;;  %837 = vmatprep.subr.bf16.mxu1 %v1639_v37  ;;  %v1625_v7 = vld [vmem:[#allocation2 + $0x294] ss:$8 sps:$4 sm:$0xff]  }
  0x5d   :  { %887 = vmatpush1.bf16.msra.mxu0 %v1554_v10  ;;  %838 = vmatpush1.bf16.msra.mxu1 %v1644_v39  ;;  %v1623_v10 = vld [vmem:[#allocation2 + $0x290] ss:$8 sps:$4 sm:$0xff]   ;;  %v166_v39 = vsub.s32 0, %v1845_v14 }
  0x5e   :  { %888 = vmatprep.subr.bf16.mxu0 %v1555_v11  ;;  %839 = vmatprep.subr.bf16.mxu1 %v1645_v40  ;;  %v1631_v11 = vld [vmem:[#allocation2 + $0x2a4] ss:$8 sps:$4 sm:$0xff]   ;;  %v162_v40 = vld [vmem:[%s2017_s2] sm:$0x3] }
  0x61   :  { %889 = vmatpush1.bf16.msra.mxu0 %v1557_v17  ;;  %840 = vmatpush1.bf16.msra.mxu1 %v1650_v43  ;;  %v1679_v17 = vld [vmem:[%s2018_s3 + $0x18] sm:$0xff]  }
  0x62   :  { %890 = vmatprep.subr.bf16.mxu0 %v1558_v21  ;;  %841 = vmatprep.subr.bf16.mxu1 %v1651_v44  ;;  %v1643_v21 = vld [vmem:[#allocation2 + $0x2c4] ss:$8 sps:$4 sm:$0xff]  }
  0x65   :  { %891 = vmatpush1.bf16.msra.mxu0 %v1560_v26  ;;  %842 = vmatpush1.bf16.msra.mxu1 %v1656_v48  ;;  %v1653_v26 = vld [vmem:[#allocation2 + $0x2e0] ss:$8 sps:$4 sm:$0xff]  }
  0x66   :  { %903 = vmatprep.subr.bf16.mxu0 %v1575_v29  ;;  %843 = vmatprep.subr.bf16.mxu1 %v1657_v49  ;;  %v1667_v29 = vld [vmem:[#allocation2 + $0x304] ss:$8 sps:$4 sm:$0xff]  }
  0x68   :  { %893 = vmatmul.mubr.bf16.vlgmr.msra.gmra.mrb[0].mxu0 %v311_v31  ;;  %v1775_v31 = vmov 0  }
  0x69   :  { %904 = vmatpush1.bf16.msra.mxu0 %v1573_v33  ;;  %935 = vmatprep.mubr.bf16.mxu0 %v316_v34  ;;  %v1682_v33 = vld [vmem:[%s2018_s3 + $0x68] sm:$0xff]   ;;  %v1687_v34 = vld [vmem:[%s2018_s3 + $0x38] sm:$0xff]  }
  0x6a   :  { %905 = vmatprep.subr.bf16.mxu0 %v1578_v35  ;;  %844 = vmatpush1.bf16.msra.mxu1 %v1662_v52  ;;  %v1776_v35 = vmov 0.0  }
  0x6b   :  { %845 = vmatprep.subr.bf16.mxu1 %v1663_v54 }
  0x6d   :  { %906 = vmatpush1.bf16.msra.mxu0 %v1576_v20 }
  0x6e   :  { %907 = vmatprep.subr.bf16.mxu0 %v1583_v38  ;;  %846 = vmatpush1.bf16.msra.mxu1 %v1668_v57 }
  0x6f   :  { %847 = vmatprep.subr.bf16.mxu1 %v1669_v60 }
  0x71   :  { %908 = vmatpush1.bf16.msra.mxu0 %v1581_v41  ;;  %v170_v41 = vsub.s32 1, %v1845_v14 }
  0x72   :  { %909 = vmatprep.subr.bf16.mxu0 %v1589_v42  ;;  %848 = vmatpush1.bf16.msra.mxu1 %v1671_v63  ;;  %v167_v42 = vrot.slane %v162_v40, %v166_v39 }
  0x73   :  { %1433 = vmatprep.subr.bf16.mxu1 %v1672_v0  ;;  %v171_v43 = vrot.slane %v162_v40, %v170_v41 }
  0x75   :  { %910 = vmatpush1.bf16.msra.mxu0 %v1587_v45  ;;  %850 = vmatmul.mubr.bf16.vlgmr.msra.gmra.mrb[0].mxu1 %v310_v3  ;;  %v1690_v3 = vld [vmem:[#allocation5 + $0x10] sm:$0xff]  }
  0x76   :  { %911 = vmatprep.subr.bf16.mxu0 %v1595_v46  ;;  %1434 = vmatpush3.bf16.msra.mxu1 %v1673_v4  ;;  %v1691_v4 = vld [vmem:[#allocation5 + $0x18] sm:$0xff]  }
  0x77   :  { %1435 = vmatprep.subr.bf16.mxu1 %v1674_v5  ;;  %v1692_v5 = vld [vmem:[#allocation5 + $0x20] sm:$0xff]  }
  0x79   :  { %912 = vmatpush1.bf16.msra.mxu0 %v1593_v47 }
  0x7a   :  { %913 = vmatprep.subr.bf16.mxu0 %v1601_v51  ;;  %1436 = vmatpush3.bf16.msra.mxu1 %v1675_v8  ;;  %v1695_v8 = vld [vmem:[#allocation5 + $0x38] sm:$0xff]  }
  0x7b   :  { %1437 = vmatprep.subr.bf16.mxu1 %v1676_v9 }
  0x7d   :  { %914 = vmatpush1.bf16.msra.mxu0 %v1599_v55 }
  0x7e   :  { %915 = vmatprep.subr.bf16.mxu0 %v1607_v56  ;;  %1438 = vmatpush3.bf16.msra.mxu1 %v1677_v12 }
  0x7f   :  { %1439 = vmatprep.subr.bf16.mxu1 %v1678_v13 }
  0x81   :  { %916 = vmatpush1.bf16.msra.mxu0 %v1605_v61 }
  0x82   :  { %917 = vmatprep.subr.bf16.mxu0 %v1613_v62  ;;  %1440 = vmatpush3.bf16.msra.mxu1 %v1679_v17 }
  0x83   :  { %1441 = vmatprep.subr.bf16.mxu1 %v1680_v18 }
  0x85   :  { %918 = vmatpush1.bf16.msra.mxu0 %v1611_v1  ;;  %v1688_v1 = vld [vmem:[#allocation5] sm:$0xff]  }
  0x86   :  { %919 = vmatprep.subr.bf16.mxu0 %v1619_v2  ;;  %1442 = vmatpush3.bf16.msra.mxu1 %v1681_v32  ;;  %v1689_v2 = vld [vmem:[#allocation5 + $0x8] sm:$0xff]  }
  0x87   :  { %1443 = vmatprep.subr.bf16.mxu1 %v1682_v33 }
  0x89   :  { %920 = vmatpush1.bf16.msra.mxu0 %v1617_v6  ;;  %v1693_v6 = vld [vmem:[#allocation5 + $0x28] sm:$0xff]  }
  0x8a   :  { %921 = vmatprep.subr.bf16.mxu0 %v1625_v7  ;;  %v1694_v7 = vld [vmem:[#allocation5 + $0x30] sm:$0xff]  }
  0x8d   :  { %922 = vmatpush1.bf16.msra.mxu0 %v1623_v10  ;;  %v1407_v10 = vld [vmem:[%s2019_s4] ss:$0 sm:$0xff] }
  0x8e   :  { %923 = vmatprep.subr.bf16.mxu0 %v1631_v11 }
  0x91   :  { %924 = vmatpush1.bf16.msra.mxu0 %v1629_v15 }
  0x92   :  { %925 = vmatprep.subr.bf16.mxu0 %v1637_v16 }
  0x95   :  { %926 = vmatpush1.bf16.msra.mxu0 %v1635_v19 }
  0x96   :  { %927 = vmatprep.subr.bf16.mxu0 %v1643_v21 }
  0x99   :  { %928 = vmatpush1.bf16.msra.mxu0 %v1641_v22 }
  0x9a   :  { %929 = vmatprep.subr.bf16.mxu0 %v1649_v23  ;;  %v1424_v23 = vld [vmem:[%s2021_s6] ss:$0 sm:$0xff] }
  0x9d   :  { %930 = vmatpush1.bf16.msra.mxu0 %v1647_v24 }
  0x9e   :  { %931 = vmatprep.subr.bf16.mxu0 %v1655_v25 }
  0xa1   :  { %932 = vmatpush1.bf16.msra.mxu0 %v1653_v26 }
  0xa2   :  { %933 = vmatprep.subr.bf16.mxu0 %v1661_v27 }
  0xa5   :  { %934 = vmatpush1.bf16.msra.mxu0 %v1659_v28 }
  0xa6   :  { %946 = vmatprep.subr.bf16.mxu0 %v1667_v29 }
  0xa8   :  { %936 = vmatmul.mubr.bf16.vlgmr.msra.gmra.mrb[0].mxu0 %v312_v58  ;;  %v1683_v58 = vld [vmem:[%s2018_s3 + $0x28] sm:$0xff]  }
  0xa9   :  { %947 = vmatpush1.bf16.msra.mxu0 %v1665_v30  ;;  %978 = vmatprep.mubr.bf16.mxu0 %v1775_v31 }
  0xaa   :  { %1444 = vmatpush3.bf16.msra.mxu1 %v1683_v58 }
  0xab   :  { %1445 = vmatprep.subr.bf16.mxu1 %v1684_v50 }
  0xae   :  { %1446 = vmatpush3.bf16.msra.mxu1 %v1685_v53 }
  0xb4   :  { %1406 = vmatmul.mubr.msk.bf16.vlgmr.msra.gmra.mrb[0].mxu0 %vm813_vm0, %v313_v59  ;;  %v1686_v59 = vld [vmem:[%s2018_s3 + $0x78] sm:$0xff]  }
  0xb5   :  { %1447 = vmatprep.subr.bf16.mxu1 %v1686_v59 }
  0xb6   :  { %1448 = vmatpush3.bf16.msra.mxu1 %v1687_v34 }
  0xb7   :  { %1464 = vmatprep.subr.bf16.mxu1 %v1776_v35 }
 0x148   :  { %v851_v36 = vpop.f32.mrb[0].mxu1 }
 0x149   :  { %v853_v37 = vpop.f32.mrb[1].mxu1  ;;  %v852_v44 = vadd.f32 %v851_v36, %v167_v42 }
 0x14a   :  { %v855_v20 = vpop.f32.mrb[2].mxu1  ;;  %v854_v45 = vadd.f32 %v853_v37, %v171_v43 }
 0x14b   :  { %v857_v38 = vpop.f32.mrb[3].mxu1  ;;  %v856_v47 = vadd.f32 %v855_v20, %v167_v42 }
 0x14c   :  { %v858_v51 = vadd.f32 %v857_v38, %v171_v43 }
 0x187   :  { %v980_v46 = vpop.f32.mrb[0].mxu0 }
 0x188   :  { %v1485_v48 = vadd.f32 %v980_v46, %v852_v44  ;;  %v982_v49 = vpop.f32.mrb[1].mxu0 }
 0x189   :  { %v1487_v52 = vadd.f32 %v982_v49, %v854_v45  ;;  %v984_v54 = vpop.f32.mrb[2].mxu0 }
 0x18a   :  { %v1489_v55 = vadd.f32 %v984_v54, %v856_v47  ;;  %v986_v56 = vpop.f32.mrb[3].mxu0  ;;  %v989_v60 = vmax.f32 %v1485_v48, 0.0 }
 0x18b   :  { %v1491_v57 = vadd.f32 %v986_v56, %v858_v51  ;;  %v990_v62 = vmax.f32 %v1487_v52, 0.0 }
 0x18c   :  { %v991_v61 = vmax.f32 %v1489_v55, 0.0 }
 0x18d   :  { %v992_v63 = vmax.f32 %v1491_v57, 0.0 }
 0x18e   :  { %v993_v0 = vpack.c.bf16 %v991_v61, %v989_v60 }
 0x18f   :  { %v994_v14 = vpack.c.bf16 %v992_v63, %v990_v62 }
 0x191   :  { %1162 = vmatprep.mubr.bf16.mxu1 %v994_v14 }
 0x192   :  { %1163 = vmatmul.mubr.bf16.vlgmr.msra.gmra.mrb[4].mxu1 %v993_v0 }
 0x193   :  { %1465 = vmatpush3.bf16.msra.mxu1 %v1688_v1  ;;  %1480 = vmatprep.mubr.msk.bf16.mxu1 %vm1777_vm1, %v1776_v35 }
 0x194   :  { %1466 = vmatprep.subr.bf16.mxu1 %v1776_v35 }
 0x197   :  { %1467 = vmatpush3.bf16.msra.mxu1 %v1689_v2 }
 0x198   :  { %1468 = vmatprep.subr.bf16.mxu1 %v1776_v35 }
 0x19b   :  { %1469 = vmatpush3.bf16.msra.mxu1 %v1690_v3 }
 0x19c   :  { %1470 = vmatprep.subr.bf16.mxu1 %v1776_v35 }
 0x19f   :  { %1471 = vmatpush3.bf16.msra.mxu1 %v1691_v4 }
 0x1a0   :  { %1472 = vmatprep.subr.bf16.mxu1 %v1776_v35 }
 0x1a3   :  { %1473 = vmatpush3.bf16.msra.mxu1 %v1692_v5 }
 0x1a4   :  { %1474 = vmatprep.subr.bf16.mxu1 %v1776_v35 }
 0x1a7   :  { %1475 = vmatpush3.bf16.msra.mxu1 %v1693_v6 }
 0x1a8   :  { %1476 = vmatprep.subr.bf16.mxu1 %v1776_v35 }
 0x1ab   :  { %1477 = vmatpush3.bf16.msra.mxu1 %v1694_v7 }
 0x1ac   :  { %1478 = vmatprep.subr.bf16.mxu1 %v1776_v35 }
 0x1af   :  { %1479 = vmatpush3.bf16.msra.mxu1 %v1695_v8 }
 0x265   :  { %v1449_v9 = vpop.f32.mrb[4].mxu1 }
 0x266   :  { %v1450_v11 = vpop.f32.mrb[5].mxu1 }
 0x267   :  { %v1451_v12 = vadd.f32 %v1450_v11, %v1449_v9  ;;  %v1452_v13 = vpop.f32.mrb[6].mxu1 }
 0x268   :  { %v1453_v15 = vpop.f32.mrb[7].mxu1 }
 0x269   :  { %v1165_v16 = vadd.f32 %v1451_v12, %v1407_v10  ;;  %v1454_v17 = vadd.f32 %v1453_v15, %v1452_v13 }
 0x26b   :  { %v1168_v18 = vadd.f32 %v1454_v17, %v1407_v10  ;;  %v1171_v19 = vmax.f32 %v1165_v16, 0.0 }
 0x26d   :  { %v1172_v21 = vmax.f32 %v1168_v18, 0.0 }
 0x26f   :  { %v1173_v22 = vpack.c.bf16 %v1172_v21, %v1171_v19 }
 0x271   :  { %1481 = vmatmul.mubr.bf16.vlgmr.msra.gmra.mrb[8].mxu1 %v1173_v22 }
 0x344   :  { %v1279_v24 = vpop.f32.mrb[8].mxu1 }
 0x345   :  { %v1280_v25 = vadd.f32 %v1424_v23, %v1279_v24  ;;  %v1482_v26 = vpop.f32.mrb[9].mxu1 }
 0x346   :  { %v1282_v27 = vpop.f32.mrb[10].mxu1 }
 0x347   :  { %v1286_v28 = vmax.f32 %v1280_v25, 0.0  ;;  %v1283_v29 = vadd.f32 %v1424_v23, %v1282_v27  ;;  %v1483_v30 = vpop.f32.mrb[11].mxu1 }
 0x349   :  { %1288 = vst [vmem:[#allocation7] sm:$0xff] %v1286_v28  ;;  %v1287_v31 = vmax.f32 %v1283_v29, 0.0 }
 0x34b   :  { %1289 = vst [vmem:[#allocation7 + $0x8] sm:$0xff] %v1287_v31 }
 0x34c   :  { %1294 = vsyncadd [#allocation4], 224  ;;  %s1778_s4 = smov [#allocation7]  }
 0x34d   :  { %s1295_s5 = sshll.u32 %s1778_s4, 4  ;;  %s1296_s5 = int_to_ptr.vmem [resolvable:$true] %s1295_s5 }
 0x34e   :  { %s1740_s28 = scalar_lea.vmem %s1296_s5, 32  ;;  %s1744_s29 = scalar_lea.vmem %s1296_s5, 256 }
 0x34f   :  { %p1741_p2 = scmp.ne.s32.totalorder %s1296_s5, %s1740_s28  ;;  %p1745_p3 = scmp.lt.s32.totalorder %s1296_s5, %s1296_s5 }
 0x350   :  { %p1746_p4 = scmp.lt.s32.totalorder %s1744_s29, %s1740_s28 }
 0x352   :  { %p1747_p5 = por %p1746_p4, %p1745_p3 }
 0x354   :  { %p1748_p6 = pnand %p1747_p5, %p1741_p2 }
 0x356   :  { %1751 = shalt.err (!%p1748_p6)
}
 0x357   :  { %s1752_s8 = scalar_lea.hbm %s2022_s7, 32 }
 0x358   :  { %p1753_p7 = scmp.ne.s32.totalorder %s2022_s7, %s1752_s8  ;;  %p1756_p8 = scmp.lt.u32.totalorder %s1752_s8, %s2022_s7 }
 0x35a   :  { %p1758_p9 = pnand %p1756_p8, %p1753_p7 }
 0x35c   :  { %1761 = shalt.err (!%p1758_p9)
}
 0x35d   :  { %s1779_s13 = smov 32   ;;  %s1780_s14 = smov 2  }
 0x35e   :  { %1301 = dma.vmem_to_hbm [thread:$0]  %s1296_s5, 32, %s2022_s7, [#allocation4], %s1779_s13, %s1779_s13, %s1780_s14  }
 0x35f   :  { %1766 = dma.done.wait [#allocation4], 256  }
 0x360   :  { %1767 = vsyncadd [#allocation4], 4294967040 }
 0x361   :  { %1305 = vsyncpa [#allocation3], 1 }
 0x362   :  { %1306 = vsyncpa [#allocation6], 1 }
 0x363   :  { %1307 = vsyncpa [#allocation4], 1 }

</bundles_post_ra>
